<compile_context>
chip_gen: v5e
topology: v5e:2x2
jax: 0.10.0
libtpu: 0.0.40
codegen_flags: <defaults>
</compile_context>

<pallas_src>
import math
import functools

import jax
import jax.numpy as jnp
from jax import lax
from jax.experimental import pallas as pl
from jax.experimental.pallas import tpu as pltpu


# ---------------------------------------------------------------------------
# Glue: transformer sinusoidal timestep embedding (standard DDPM-style).
# ---------------------------------------------------------------------------
def transformer_timestep_embedding(timesteps, embedding_dim, max_positions=10000):
    timesteps = jnp.asarray(timesteps, jnp.float32)
    half_dim = embedding_dim // 2
    emb = math.log(max_positions) / (half_dim - 1)
    emb = jnp.exp(jnp.arange(half_dim, dtype=jnp.float32) * -emb)
    emb = timesteps[:, None] * emb[None, :]
    emb = jnp.concatenate([jnp.sin(emb), jnp.cos(emb)], axis=1)
    if embedding_dim % 2 == 1:  # zero pad (time_embed_dim=19 is odd)
        emb = jnp.pad(emb, ((0, 0), (0, 1)))
    return emb  # (B, embedding_dim)


# ---------------------------------------------------------------------------
# Pallas kernel: BB batch elements per grid step, adjacency kept in its
# streamed dtype (bf16) all the way into the MXU.
# ---------------------------------------------------------------------------
def _gcn_kernel(x_ref, adj_ref, eye_ref, w_ref, twbt_ref, o_ref, *,
                loop_val, add_loop):
    bb, n, f = x_ref.shape
    c = w_ref.shape[1]
    f32 = jnp.float32

    # ---- x @ W for all BB graphs as a single MXU call: (BB*N, F) @ (F, C) ----
    h = jnp.dot(x_ref[...].reshape(bb * n, f), w_ref[...],
                preferred_element_type=f32).reshape(bb, n, c)       # (BB,N,C) f32

    adj = adj_ref[...]                                              # (BB,N,N) bf16/f32

    # ---- degrees of the self-loop-modified adjacency, without rewriting it ----
    # rowsum in the streamed dtype: exact for 0/1 adjacencies (integer partial
    # sums <= 256 are exact in bf16); f32 when stream_adj_bf16=False.
    # TODO(synk): for N > 256 dense bf16 graphs use an f32-accumulated rowsum.
    rowsum = jnp.sum(adj, axis=-1, keepdims=True).astype(f32)       # (BB,N,1)
    if add_loop:
        # diag(A): one nonzero per row -> sum is exact in any dtype.
        diag = jnp.sum(adj * eye_ref[...], axis=-1,
                       keepdims=True).astype(f32)                   # (BB,N,1)
        corr = jnp.asarray(loop_val, f32) - diag                    # (BB,N,1)
        deg = rowsum + corr
    else:
        corr = None
        deg = rowsum
    dinv = lax.rsqrt(jnp.maximum(deg, 1.0))                         # (BB,N,1)

    # ---- reassociated symmetric normalization:
    #      (D^-1/2 A' D^-1/2) @ h == dinv * (A' @ (dinv * h))
    #      A' @ z == A @ z + (loop_val - diag(A)) * z                ----
    z32 = dinv * h                                                  # (BB,N,C) f32
    z = z32.astype(adj.dtype)                                       # bf16 for the MXU
    agg = lax.dot_general(adj, z,
                          dimension_numbers=(((2,), (1,)), ((0,), (0,))),
                          preferred_element_type=f32)               # (BB,N,C) f32 acc
    if add_loop:
        agg = agg + corr * z32                                      # self-loop term, f32
    out = dinv * agg

    # ---- time-conditioned scale + fused (bias + time_bias) shift ----
    out = twbt_ref[:, 0:1, :] * out + twbt_ref[:, 1:2, :]           # (BB,1,C) bcast
    o_ref[...] = out.astype(o_ref.dtype)


# ---------------------------------------------------------------------------
# VMEM planning: honest per-step accounting + per-generation budget.
# ---------------------------------------------------------------------------
def _vmem_capacity_bytes():
    try:
        info = pltpu.get_tpu_info()
        for attr in ("vmem_capacity_bytes", "vmem_bytes", "vmem_size_bytes"):
            v = getattr(info, attr, None)
            if v:
                return int(v)
    except Exception:
        pass
    return 64 * 1024 * 1024  # conservative fallback (v7x per-core VMEM)


def _per_step_vmem_bytes(bb, n, f, c, adj_bytes):
    dbl = 2  # Pallas double-buffers every BlockSpec operand
    stream = dbl * bb * n * n * adj_bytes            # adj blocks
    stream += dbl * bb * n * f * 4                   # x blocks (f32)
    stream += dbl * bb * n * c * 4                   # output blocks (f32)
    stream += dbl * bb * 2 * c * 4                   # fused time scale/shift block
    stream += dbl * f * c * 4                        # weight (resident, still 2 bufs)
    stream += dbl * n * n * adj_bytes                # identity (resident)
    # in-kernel intermediates: h / z32 / agg (f32), z (adj dtype), adj*eye temp,
    # degree/dinv columns (lane-padded to 128).
    interm = bb * n * c * (4 + 4 + 4 + adj_bytes)
    interm += bb * n * n * adj_bytes
    interm += 4 * bb * n * 128 * 4
    return stream + interm


def _plan_blocks(B, N, F, C, adj_bytes):
    cap = _vmem_capacity_bytes()
    if cap <= (64 << 20):
        # v7x-class: 64 MiB per TensorCore, 2 cores -> keep >=4 grid steps.
        budget, vmem_limit, min_steps = (20 << 20), (40 << 20), 4
    else:
        # v5e / v6e: 128 MiB physical VMEM -> larger blocks, fewer steps.
        budget, vmem_limit, min_steps = (48 << 20), (96 << 20), 2

    min_steps = max(1, min(min_steps, B))
    bb_cap = max(1, B // min_steps)
    bb = 1
    for cand in range(1, bb_cap + 1):
        if _per_step_vmem_bytes(cand, N, F, C, adj_bytes) <= budget:
            bb = cand

    need1 = _per_step_vmem_bytes(1, N, F, C, adj_bytes)
    if need1 > budget:
        # TODO(synk): tile over N for very large graphs; for now widen the limit.
        vmem_limit = min(int(cap * 0.9), max(vmem_limit, need1 + (8 << 20)))
    return bb, vmem_limit


# ---------------------------------------------------------------------------
# Wrapper.
# ---------------------------------------------------------------------------
def temporal_dense_gcn_forward(x, adj, time, params, *, improved=False,
                               add_loop=True, stream_adj_bf16=True):
    """x: (B,N,F) f32, adj: (B,N,N), time: (B,) f32 -> (B,N,C).

    stream_adj_bf16=True halves the dominant HBM stream and enables a native
    bf16 MXU matmul; it is exact for 0/1 (and small-integer) adjacencies.
    Pass stream_adj_bf16=False for arbitrary weighted adjacencies.
    """
    if x.ndim == 2:
        x = x[None]
    if adj.ndim == 2:
        adj = adj[None]
    B, N, F = x.shape
    if adj.shape[0] != B:  # adjacency broadcastable in the batch dim
        adj = jnp.broadcast_to(adj, (B, N, N))
    C = params["weight"].shape[1]

    # --- glue: timestep embedding + the two small time Linear layers ---
    temb = transformer_timestep_embedding(time, params["time_embed_dim"])   # (B,T)
    time_scale = temb @ params["tw_w"] + params["tw_b"]                     # (B,C)
    time_shift = temb @ params["tb_w"] + params["tb_b"] + params["bias"][None, :]
    twbt = jnp.stack([time_scale, time_shift], axis=1).astype(jnp.float32)  # (B,2,C)

    # NOTE: ideally the caller stores adj in bf16 already so this cast fuses
    # away instead of costing an extra HBM pass.
    adj_in = adj.astype(jnp.bfloat16) if stream_adj_bf16 else adj.astype(jnp.float32)
    adj_bytes = jnp.dtype(adj_in.dtype).itemsize
    eye = jnp.eye(N, dtype=adj_in.dtype)                                    # resident

    BB, vmem_limit = _plan_blocks(B, N, F, C, adj_bytes)

    # Pad the batch so awkward/prime B still gets the chosen block-batch.
    Bp = -(-B // BB) * BB
    if Bp != B:
        pad = Bp - B
        x = jnp.pad(x, ((0, pad), (0, 0), (0, 0)))
        adj_in = jnp.pad(adj_in, ((0, pad), (0, 0), (0, 0)))
        twbt = jnp.pad(twbt, ((0, pad), (0, 0), (0, 0)))

    kernel = functools.partial(_gcn_kernel,
                               loop_val=2.0 if improved else 1.0,
                               add_loop=add_loop)

    out = pl.pallas_call(
        kernel,
        out_shape=jax.ShapeDtypeStruct((Bp, N, C), x.dtype),
        grid_spec=pltpu.PrefetchScalarGridSpec(
            num_scalar_prefetch=0,
            grid=(Bp // BB,),
            in_specs=[
                pl.BlockSpec((BB, N, F), lambda b: (b, 0, 0)),    # x
                pl.BlockSpec((BB, N, N), lambda b: (b, 0, 0)),    # adj (bf16 stream)
                pl.BlockSpec((N, N), lambda b: (0, 0)),           # identity (resident)
                pl.BlockSpec((F, C), lambda b: (0, 0)),           # weight (resident)
                pl.BlockSpec((BB, 2, C), lambda b: (b, 0, 0)),    # time scale + shift
            ],
            out_specs=pl.BlockSpec((BB, N, C), lambda b: (b, 0, 0)),
        ),
        compiler_params=pltpu.CompilerParams(
            dimension_semantics=("parallel",),
            vmem_limit_bytes=vmem_limit,
        ),
    )(x, adj_in, eye, params["weight"].astype(jnp.float32), twbt)

    # TODO(synk): optional node mask (out * mask[:, :, None]) not implemented;
    #             matches the mask=None path of the PyTorch module.
    return out[:B] if Bp != B else out


# ---------------------------------------------------------------------------
# Deterministic parameter init (mirrors the module's __init__ shapes).
# ---------------------------------------------------------------------------
def init_params(key, in_channels, out_channels, time_embed_dim=19):
    k1, k2, k3, k4, k5 = jax.random.split(key, 5)
    stdv = math.sqrt(6.0 / (in_channels + out_channels))        # glorot
    weight = jax.random.uniform(k1, (in_channels, out_channels),
                                jnp.float32, -stdv, stdv)
    bias = jnp.zeros((out_channels,), jnp.float32)
    lim = 1.0 / math.sqrt(time_embed_dim)                       # nn.Linear default
    tw_w = jax.random.uniform(k2, (time_embed_dim, out_channels),
                              jnp.float32, -lim, lim)
    tw_b = jax.random.uniform(k3, (out_channels,), jnp.float32, -lim, lim)
    tb_w = jax.random.uniform(k4, (time_embed_dim, out_channels),
                              jnp.float32, -lim, lim)
    tb_b = jax.random.uniform(k5, (out_channels,), jnp.float32, -lim, lim)
    return dict(weight=weight, bias=bias,
                tw_w=tw_w, tw_b=tw_b, tb_w=tb_w, tb_b=tb_b,
                time_embed_dim=time_embed_dim)


# ---------------------------------------------------------------------------
# Pure-JAX reference (full f32, literal transcription of the PyTorch forward).
# ---------------------------------------------------------------------------
def reference_forward(x, adj, time, params, *, improved=False):
    B, N, _ = adj.shape
    temb = transformer_timestep_embedding(time, params["time_embed_dim"])
    tw = temb @ params["tw_w"] + params["tw_b"]
    tb = temb @ params["tb_w"] + params["tb_b"]
    eye = jnp.eye(N, dtype=adj.dtype)
    loop_val = 2.0 if improved else 1.0
    adj = jnp.where(eye[None] > 0, loop_val, adj)
    out = x @ params["weight"]
    deg = jnp.maximum(adj.sum(-1), 1.0) ** -0.5
    adj = deg[..., :, None] * adj * deg[..., None, :]
    out = adj @ out
    out = tw[:, None, :] * out
    out = out + params["bias"] + tb[:, None, :]
    return out


if __name__ == "__main__":
    key = jax.random.PRNGKey(0)
    B, N, F, C = 2, 16, 8, 32

    kx, ka, kt, kp = jax.random.split(key, 4)
    x = jax.random.normal(kx, (B, N, F), jnp.float32)
    adj = (jax.random.uniform(ka, (B, N, N)) > 0.5).astype(jnp.float32)
    adj = jnp.maximum(adj, jnp.swapaxes(adj, -1, -2))      # symmetric 0/1 adjacency
    time = jax.random.uniform(kt, (B,), jnp.float32) * 10.0

    params = init_params(kp, F, C, time_embed_dim=19)

    out = temporal_dense_gcn_forward(x, adj, time, params)
    out = jax.block_until_ready(out)

    ref = reference_forward(x, adj, time, params)
    assert out.shape == (B, N, C)
    # bf16 MXU matmul (f32 accumulate) vs full-f32 reference -> loose tolerance.
    assert jnp.allclose(out, ref, atol=2e-2, rtol=2e-2), "mismatch vs reference"

    print("KERNEL_OK")
</pallas_src>

<mosaic_0001>
module attributes {stable_mosaic.version = 11 : i64} {
  func.func @_gcn_kernel(%arg0: i32, %arg1: memref<1x16x8xf32, #tpu.memory_space<vmem>>, %arg2: memref<1x16x16xbf16, #tpu.memory_space<vmem>>, %arg3: memref<16x16xbf16, #tpu.memory_space<vmem>>, %arg4: memref<8x32xf32, #tpu.memory_space<vmem>>, %arg5: memref<1x2x32xf32, #tpu.memory_space<vmem>>, %arg6: memref<1x16x32xf32, #tpu.memory_space<vmem>>) attributes {dimension_semantics = [#tpu.dimension_semantics<parallel>], iteration_bounds = array<i64: 2>, scalar_prefetch = 0 : i64, scratch_operands = 0 : i64, tpu.core_type = #tpu.core_type<tc>, window_params = [{transform_indices = @transform_0, window_bounds = array<i64: 1, 16, 8>}, {transform_indices = @transform_1, window_bounds = array<i64: 1, 16, 16>}, {pipeline_mode = #tpu.pipeline_mode<synchronous>, transform_indices = @transform_2, window_bounds = array<i64: 16, 16>}, {pipeline_mode = #tpu.pipeline_mode<synchronous>, transform_indices = @transform_3, window_bounds = array<i64: 8, 32>}, {transform_indices = @transform_4, window_bounds = array<i64: 1, 2, 32>}, {transform_indices = @transform_5, window_bounds = array<i64: 1, 16, 32>}]} {
    %c0 = arith.constant 0 : index
    %c0_0 = arith.constant 0 : index
    %c0_1 = arith.constant 0 : index
    %0 = vector.load %arg1[%c0, %c0_0, %c0_1] : memref<1x16x8xf32, #tpu.memory_space<vmem>>, vector<1x16x8xf32>
    %1 = vector.shape_cast %0 : vector<1x16x8xf32> to vector<16x8xf32>
    %c0_2 = arith.constant 0 : index
    %c0_3 = arith.constant 0 : index
    %2 = vector.load %arg4[%c0_2, %c0_3] : memref<8x32xf32, #tpu.memory_space<vmem>>, vector<8x32xf32>
    %cst = arith.constant dense<0.000000e+00> : vector<16x32xf32>
    %3 = tpu.matmul %1, %2, %cst {dimension_numbers = #tpu.dot_dimension_numbers<[1], [0], [0], [1], [0, 0, 1, 1], [], []>} : vector<16x8xf32>, vector<8x32xf32>, vector<16x32xf32> -> vector<16x32xf32>
    %4 = vector.shape_cast %3 : vector<16x32xf32> to vector<1x16x32xf32>
    %c0_4 = arith.constant 0 : index
    %c0_5 = arith.constant 0 : index
    %c0_6 = arith.constant 0 : index
    %5 = vector.load %arg2[%c0_4, %c0_5, %c0_6] : memref<1x16x16xbf16, #tpu.memory_space<vmem>>, vector<1x16x16xbf16>
    %6 = arith.extf %5 : vector<1x16x16xbf16> to vector<1x16x16xf32>
    %cst_7 = arith.constant dense<0.000000e+00> : vector<1x16xf32>
    %7 = vector.multi_reduction <add>, %6, %cst_7 [2] : vector<1x16x16xf32> to vector<1x16xf32>
    %8 = vector.shape_cast %7 : vector<1x16xf32> to vector<1x16x1xf32>
    %9 = arith.truncf %8 : vector<1x16x1xf32> to vector<1x16x1xbf16>
    %10 = arith.extf %9 : vector<1x16x1xbf16> to vector<1x16x1xf32>
    %c0_8 = arith.constant 0 : index
    %c0_9 = arith.constant 0 : index
    %11 = vector.load %arg3[%c0_8, %c0_9] : memref<16x16xbf16, #tpu.memory_space<vmem>>, vector<16x16xbf16>
    %12 = vector.shape_cast %11 : vector<16x16xbf16> to vector<1x16x16xbf16>
    %13 = arith.mulf %5, %12 : vector<1x16x16xbf16>
    %14 = arith.extf %13 : vector<1x16x16xbf16> to vector<1x16x16xf32>
    %cst_10 = arith.constant dense<0.000000e+00> : vector<1x16xf32>
    %15 = vector.multi_reduction <add>, %14, %cst_10 [2] : vector<1x16x16xf32> to vector<1x16xf32>
    %16 = vector.shape_cast %15 : vector<1x16xf32> to vector<1x16x1xf32>
    %17 = arith.truncf %16 : vector<1x16x1xf32> to vector<1x16x1xbf16>
    %18 = arith.extf %17 : vector<1x16x1xbf16> to vector<1x16x1xf32>
    %cst_11 = arith.constant 1.000000e+00 : f32
    %19 = vector.broadcast %cst_11 : f32 to vector<1x16x1xf32>
    %20 = arith.subf %19, %18 : vector<1x16x1xf32>
    %21 = arith.addf %10, %20 : vector<1x16x1xf32>
    %cst_12 = arith.constant 1.000000e+00 : f32
    %22 = vector.broadcast %cst_12 : f32 to vector<1x16x1xf32>
    %23 = arith.maximumf %21, %22 : vector<1x16x1xf32>
    %24 = math.rsqrt %23 : vector<1x16x1xf32>
    %25 = vector.broadcast %24 : vector<1x16x1xf32> to vector<1x16x32xf32>
    %26 = arith.mulf %25, %4 : vector<1x16x32xf32>
    %27 = arith.truncf %26 : vector<1x16x32xf32> to vector<1x16x32xbf16>
    %cst_13 = arith.constant dense<0.000000e+00> : vector<1x16x32xf32>
    %28 = tpu.matmul %5, %27, %cst_13 {dimension_numbers = #tpu.dot_dimension_numbers<[2], [1], [1], [2], [0, 0, 0, 1, 1, 2], [0], [0]>} : vector<1x16x16xbf16>, vector<1x16x32xbf16>, vector<1x16x32xf32> -> vector<1x16x32xf32>
    %29 = vector.broadcast %20 : vector<1x16x1xf32> to vector<1x16x32xf32>
    %30 = arith.mulf %29, %26 : vector<1x16x32xf32>
    %31 = arith.addf %28, %30 : vector<1x16x32xf32>
    %32 = vector.broadcast %24 : vector<1x16x1xf32> to vector<1x16x32xf32>
    %33 = arith.mulf %32, %31 : vector<1x16x32xf32>
    %c0_14 = arith.constant 0 : index
    %c0_15 = arith.constant 0 : index
    %c0_16 = arith.constant 0 : index
    %34 = vector.load %arg5[%c0_14, %c0_15, %c0_16] : memref<1x2x32xf32, #tpu.memory_space<vmem>>, vector<1x1x32xf32>
    %35 = vector.broadcast %34 : vector<1x1x32xf32> to vector<1x16x32xf32>
    %36 = arith.mulf %35, %33 : vector<1x16x32xf32>
    %c0_17 = arith.constant 0 : index
    %c1 = arith.constant 1 : index
    %c0_18 = arith.constant 0 : index
    %37 = vector.load %arg5[%c0_17, %c1, %c0_18] : memref<1x2x32xf32, #tpu.memory_space<vmem>>, vector<1x1x32xf32>
    %38 = vector.broadcast %37 : vector<1x1x32xf32> to vector<1x16x32xf32>
    %39 = arith.addf %36, %38 : vector<1x16x32xf32>
    %c0_19 = arith.constant 0 : index
    %c0_20 = arith.constant 0 : index
    %c0_21 = arith.constant 0 : index
    %40 = vector.load %arg6[%c0_19, %c0_20, %c0_21] : memref<1x16x32xf32, #tpu.memory_space<vmem>>, vector<1x16x32xf32>
    tpu.vector_store %arg6[%c0_19, %c0_20, %c0_21], %39 {strides = array<i32>} : memref<1x16x32xf32, #tpu.memory_space<vmem>>, vector<1x16x32xf32>,
    return
  }
  func.func @transform_0(%arg0: i32) -> (i32, i32, i32) {
    %c0_i32 = arith.constant 0 : i32
    %c0_i32_0 = arith.constant 0 : i32
    %c0_i32_1 = arith.constant 0 : i32
    return %arg0, %c0_i32, %c0_i32_0 : i32, i32, i32
  }
  func.func @transform_1(%arg0: i32) -> (i32, i32, i32) {
    %c0_i32 = arith.constant 0 : i32
    %c0_i32_0 = arith.constant 0 : i32
    %c0_i32_1 = arith.constant 0 : i32
    return %arg0, %c0_i32, %c0_i32_0 : i32, i32, i32
  }
  func.func @transform_2(%arg0: i32) -> (i32, i32) {
    %c0_i32 = arith.constant 0 : i32
    %c0_i32_0 = arith.constant 0 : i32
    %c0_i32_1 = arith.constant 0 : i32
    return %c0_i32, %c0_i32_0 : i32, i32
  }
  func.func @transform_3(%arg0: i32) -> (i32, i32) {
    %c0_i32 = arith.constant 0 : i32
    %c0_i32_0 = arith.constant 0 : i32
    %c0_i32_1 = arith.constant 0 : i32
    return %c0_i32, %c0_i32_0 : i32, i32
  }
  func.func @transform_4(%arg0: i32) -> (i32, i32, i32) {
    %c0_i32 = arith.constant 0 : i32
    %c0_i32_0 = arith.constant 0 : i32
    %c0_i32_1 = arith.constant 0 : i32
    return %arg0, %c0_i32, %c0_i32_0 : i32, i32, i32
  }
  func.func @transform_5(%arg0: i32) -> (i32, i32, i32) {
    %c0_i32 = arith.constant 0 : i32
    %c0_i32_0 = arith.constant 0 : i32
    %c0_i32_1 = arith.constant 0 : i32
    return %arg0, %c0_i32, %c0_i32_0 : i32, i32, i32
  }
}

</mosaic_0001>

<bundles_post_ra>
// kernel: tpu_custom_call.1
= control target key start
LH: loop header
LB: loop body
LE: loop exit
PB: predicated region body
PF: predicated region fallthrough
CT: control target
= control target key end

     0   :  { %10 = vsyncpa [#allocation3], 0  ;;  %s793_s0 = inlined_call_operand.vmem [shape: f32[2,16,8], index: 0, kind: input, shape index: {}]   ;;  %s794_s1 = inlined_call_operand.vmem [shape: bf16[2,16,16], index: 1, kind: input, shape index: {}]   ;;  %s795_s2 = inlined_call_operand.vmem [shape: bf16[16,16], index: 2, kind: input, shape index: {}]   ;;  %s796_s3 = inlined_call_operand.vmem [shape: f32[8,32], index: 3, kind: input, shape index: {}]   ;;  %s797_s4 = inlined_call_operand.vmem [shape: f32[2,2,32], index: 4, kind: input, shape index: {}]   ;;  %s798_s5 = inlined_call_operand.hbm [shape: f32[2,16,32], index: 5, kind: output, shape index: {}]  }
   0x1   :  { %12 = vsyncpa [#allocation3 + $0x1], 0  ;;  %s676_s18 = smov 0   ;;  %s678_s19 = smov 0  }
   0x2   :  { %s680_s20 = smov 0   ;;  %s682_s21 = smov 0  }
   0x3 LB: > { %s697_s22 = sadd.s32 4294967295, %s642_s21   ;;  %s503_s23 = sadd.s32 4294967294, %s642_s21   ;;  %s642_s21 = sphi %s682_s21, %s804_s21   ;;  %s638_s20 = sphi %s680_s20, %s803_s20   ;;  %s634_s19 = sphi %s678_s19, %s802_s19   ;;  %s630_s18 = sphi %s676_s18, %s801_s18  }
   0x4   : > { %s701_s24 = sadd.s32 1, %s642_s21   ;;  %s145_s25 = sadd.s32 1, %s638_s20 }
   0x5   : > { %s142_s26 = ssub.s32 %s642_s21, %s701_s24  ;;  %p155_p0 = scmp.ne.s32.totalorder %s638_s20, %s634_s19 }
   0x6   : > { %p143_p1 = scmp.eq.s32.totalorder %s142_s26, 0  ;;  %p156_p2 = scmp.eq.s32.totalorder %s697_s22, 1 }
   0x7   : > { %p161_p3 = scmp.ne.s32.totalorder %s634_s19, %s630_s18  ;;  %p162_p4 = scmp.eq.s32.totalorder %s503_s23, 1 }
   0x8   : > { %s712_s27 = scalar_select %p143_p1, %s638_s20, %s145_s25  }
   0x9   : > { %p714_p5 = por %p156_p2, %p155_p0  ;;  %p718_p6 = por %p162_p4, %p161_p3 }
   0xa   : > { %p506_p7 = scmp.ge.s32.totalorder %s642_s21, 1  ;;  %p209_p8 = scmp.lt.s32.totalorder %s642_s21, 3 }
   0xc   : > { %p210_p9 = pnand %p506_p7, %p209_p8 }
   0xd   : > { %p246_p10 = scmp.lt.s32.totalorder (!%p210_p9), %s697_s22, 1  ;;  %s243_s6 = sand.u32 (!%p210_p9), 1, %s634_s19  }
   0xe   : > { %213 = sbr.rel (%p210_p9) target bundleno = 342 (0x156), region = 40  ;;  %s528_s8 = sshll.u32 (!%p210_p9), %s697_s22, 4 }
   0xf   : > { %s600_s25 = scalar_lea.hbm (!%p210_p9), %s798_s5, 32 }
  0x13   : > { %v263_v0 = vld [vmem:[%s796_s3] sm:$0xff]  ;;  %s729_s7 = scalar_select %p246_p10, %s697_s22, 1  ;;  %vm264_vm0 = vcmask 64512   ;;  %vm298_vm1 = vcmask 130048   ;;  %vm398_vm8 = vcmask 261120  }
  0x14   : > { %286 = vmatpush.msra.mxu0 %v263_v0  ;;  %v530_v1 = vld [vmem:[%s795_s2] sm:$0xff]   ;;  %s402_s22 = scalar_lea.sflag [#allocation3], %s243_s6 }
  0x15   : > { %s526_s10 = sshll.u32 %s729_s7, 3  ;;  %s525_s11 = sshll.u32 %s729_s7, 4  ;;  %v531_v2 = vunpack.c.l.bf16 %v530_v1  ;;  %v532_v3 = vunpack.c.h.bf16 %v530_v1 }
  0x16   : > { %s739_s14 = scalar_lea.vmem %s794_s1, %s526_s10  ;;  %s250_s17 = scalar_lea.vmem %s793_s0, %s525_s11 }
  0x17   : > { %v294_v4 = vld [vmem:[%s739_s14] sm:$0xff]   ;;  %v262_v12 = vld [vmem:[%s250_s17 + $0x8] sm:$0xff]  ;;  %s512_s23 = sshll.u32 %s729_s7, 1  ;;  %s507_s7 = sshll.u32 %s243_s6, 4 }
  0x18   : > { %v261_v5 = vld [vmem:[%s250_s17] sm:$0xff]  ;;  %v296_v6 = vunpack.c.l.bf16 %v294_v4  ;;  %v297_v7 = vunpack.c.h.bf16 %v294_v4  ;;  %s755_s30 = scalar_lea.vmem %s797_s4, %s512_s23  ;;  %s413_s11 = scalar_lea.hbm %s798_s5, %s528_s8 }
  0x19   : > { %513 = vmatmul.msk.f32.vlgmr.msra.gmra.mxu0 %vm264_vm0, %v261_v5  ;;  %v527_v61 = vld [vmem:[%s739_s14] sm:$0xff]  ;;  %s245_s12 = scalar_lea.vmem [#allocation2], %s507_s7  ;;  %s416_s14 = sshll.u32 %s413_s11, 4  ;;  %s417_s14 = int_to_ptr.hbm [resolvable:$true] %s416_s14 }
  0x1a   : > { %v313_v8 = vmul.f32 %v531_v2, %v296_v6  ;;  %v314_v9 = vmul.f32 %v532_v3, %v297_v7  ;;  %v299_v10 = vsel %vm298_vm1, %v296_v6, 0.0  ;;  %v302_v15 = vsel %vm298_vm1, %v297_v7, 0.0  ;;  %v574_v0 = vld [vmem:[%s755_s30] ss:$0 sm:$0xff]  ;;  %v575_v2 = vld [vmem:[%s755_s30 + $0x1] ss:$0 sm:$0xff] }
  0x1b   : > { %300 = vadd.xlane.f32.xlu1 %v299_v10  ;;  %s414_s13 = sshll.u32 %s245_s12, 4  ;;  %s594_s15 = sshra.s32 %s417_s14, 4  ;;  %s415_s13 = int_to_ptr.vmem [resolvable:$true] %s414_s13  ;;  %s595_s15 = int_to_ptr.hbm [resolvable:$true] %s594_s15 }
  0x1c   : > { %v315_v11 = vpack.c.bf16 %v314_v9, %v313_v8  ;;  %s596_s16 = scalar_lea.hbm %s595_s15, 16  ;;  %p601_p0 = scmp.lt.s32.totalorder %s595_s15, %s798_s5 }
  0x1d   : > { %p597_p11 = scmp.ne.s32.totalorder %s595_s15, %s596_s16  ;;  %p602_p1 = scmp.lt.s32.totalorder %s600_s25, %s596_s16 }
  0x1e   : > { %v316_v13 = vunpack.c.l.bf16 %v315_v11  ;;  %v317_v16 = vunpack.c.h.bf16 %v315_v11 }
  0x1f   : > { %p598_p12 = pnand %p597_p11, %p714_p5  ;;  %p603_p2 = por %p602_p1, %p601_p0 }
  0x20   : > { %v318_v14 = vsel %vm298_vm1, %v316_v13, 0.0  ;;  %v321_v17 = vsel %vm298_vm1, %v317_v16, 0.0 }
  0x21   : > { %514 = vmatmul.msk.f32.gmra.mxu0 %vm264_vm0, %v262_v12  ;;  %319 = vadd.xlane.f32.xlu0 %v318_v14  ;;  %p599_p13 = pneg %p598_p12 }
  0x23   : > { %303 = vadd.xlane.f32.xlu1 %v302_v15  ;;  %p604_p3 = pnand %p603_p2, %p599_p13 }
  0x29   : > { %322 = vadd.xlane.f32.xlu0 %v321_v17 }
  0x8e   : > { %v301_v18 = vpop.xlane.xlu1 %300 }
  0x8f   : > { %v305_v19 = vpack.c.bf16 %v301_v18, %v301_v18 }
  0x91   : > { %v307_v23 = vunpack.c.l.bf16 %v305_v19 }
  0x94   : > { %v320_v20 = vpop.xlane.xlu0 %319 }
  0x95   : > { %v324_v21 = vpack.c.bf16 %v320_v20, %v320_v20 }
  0x96   : > { %v304_v24 = vpop.xlane.xlu1 %303  ;;  %v288_v40 = vpop.f32.mrf.mxu0 }
  0x97   : > { %v326_v22 = vunpack.c.l.bf16 %v324_v21  ;;  %v306_v27 = vpack.c.bf16 %v304_v24, %v304_v24 }
  0x99   : > { %v328_v25 = vsub.f32 1.0, %v326_v22  ;;  %v308_v32 = vunpack.c.l.bf16 %v306_v27 }
  0x9b   : > { %v330_v26 = vadd.f32 %v328_v25, %v307_v23 }
  0x9c   : > { %v323_v28 = vpop.xlane.xlu0 %322 }
  0x9d   : > { %v332_v29 = vmax.f32 %v330_v26, 1.0  ;;  %v325_v30 = vpack.c.bf16 %v323_v28, %v323_v28 }
  0x9e   : > { %v291_v51 = vpop.f32.mrf.mxu0 }
  0x9f   : > { %576 = vrsqrt.f32 %v332_v29  ;;  %v327_v31 = vunpack.c.l.bf16 %v325_v30  ;;  %vm340_vm3 = vweird.f32 %v332_v29 }
  0xa1   : > { %v329_v33 = vsub.f32 1.0, %v327_v31 }
  0xa3   : > { %v331_v34 = vadd.f32 %v329_v33, %v308_v32 }
  0xa5   : > { %v577_v35 = vpop.eup %576  ;;  %v333_v36 = vmax.f32 %v331_v34, 1.0 }
  0xa6   : > { %v335_v37 = vmul.f32 %v577_v35, %v332_v29  ;;  %vm341_vm2 = vweird.f32 %v577_v35 }
  0xa7   : > { %578 = vrsqrt.f32 %v333_v36  ;;  %vm342_vm4 = vmor %vm340_vm3, %vm341_vm2  ;;  %vm350_vm6 = vweird.f32 %v333_v36 }
  0xa8   : > { %v336_v38 = vmul.f32 %v577_v35, %v335_v37 }
  0xaa   : > { %v337_v39 = vmul.f32 0.5, %v336_v38 }
  0xac   : > { %v338_v41 = vsub.f32 1.5, %v337_v39 }
  0xad   : > { %v579_v42 = vpop.eup %578 }
  0xae   : > { %v345_v43 = vmul.f32 %v579_v42, %v333_v36  ;;  %v339_v44 = vmul.f32 %v577_v35, %v338_v41  ;;  %vm351_vm5 = vweird.f32 %v579_v42 }
  0xaf   : > { %vm352_vm7 = vmor %vm350_vm6, %vm351_vm5 }
  0xb0   : > { %v343_v45 = vsel %vm342_vm4, %v577_v35, %v339_v44  ;;  %v346_v46 = vmul.f32 %v579_v42, %v345_v43 }
  0xb1   : > { %v354_v47 = vmul.f32 %v343_v45, %v288_v40 }
  0xb2   : > { %v347_v48 = vmul.f32 0.5, %v346_v46 }
  0xb3   : > { %v358_v49 = vmul.f32 %v354_v47, %v328_v25  ;;  %v356_v55 = vpack.c.bf16 %v354_v47, %v354_v47 }
  0xb4   : > { %v348_v50 = vsub.f32 1.5, %v347_v48 }
  0xb5   : > { %v367_v58 = vunpack.c.l.b16 %v356_v55 }
  0xb6   : > { %v349_v52 = vmul.f32 %v579_v42, %v348_v50 }
  0xb8   : > { %v353_v53 = vsel %vm352_vm7, %v579_v42, %v349_v52 }
  0xb9   : > { %v355_v54 = vmul.f32 %v353_v53, %v291_v51 }
  0xbb   : > { %v357_v56 = vpack.c.bf16 %v355_v54, %v355_v54  ;;  %v359_v57 = vmul.f32 %v355_v54, %v329_v33 }
  0xbd   : > { %v368_v59 = vunpack.c.l.b16 %v357_v56 }
  0xbf   : > { %v369_v60 = vpack.c.b16 %v368_v59, %v367_v58 }
  0xc1   : > { %381 = vmatpush.bf16.msra.mxu1 %v369_v60 }
  0xc4   : > { %519 = vmatmul.msk.bf16.vlgmr.msra.gmra.mxu1 %vm298_vm1, %v527_v61 }
 0x141   : > { %v383_v62 = vpop.f32.mrf.mxu1 }
 0x142   : > { %v384_v63 = vadd.f32 %v383_v62, %v358_v49 }
 0x144   : > { %v388_v1 = vmul.f32 %v384_v63, %v343_v45 }
 0x146   : > { %v392_v3 = vmul.f32 %v574_v0, %v388_v1 }
 0x148   : > { %v396_v4 = vadd.f32 %v575_v2, %v392_v3 }
 0x149   : > { %v385_v5 = vpop.f32.mrf.mxu1 }
 0x14a   : > { %399 = vst.msk [vmem:[%s245_s12] sm:$0xff] %vm398_vm8, %v396_v4  ;;  %v386_v6 = vadd.f32 %v385_v5, %v359_v57 }
 0x14c   : > { %v389_v7 = vmul.f32 %v386_v6, %v353_v53 }
 0x14e   : > { %v393_v8 = vmul.f32 %v574_v0, %v389_v7 }
 0x150   : > { %v397_v9 = vadd.f32 %v575_v2, %v393_v8 }
 0x152   : > { %400 = vst.msk [vmem:[%s245_s12 + $0x8] sm:$0xff] %vm398_vm8, %v397_v9 }
 0x153   : > { %607 = shalt.err (!%p604_p3)
}
 0x154   : > { %s644_s6 = smov 128   ;;  %s645_s7 = smov 8  }
 0x155   : > { %533 = dma.vmem_to_hbm [thread:$0]  (%p714_p5), %s415_s13, 256, %s417_s14, %s402_s22, %s644_s6, %s644_s6, %s645_s7  }
 0x156 PF: > { %p539_p4 = scmp.ge.s32.totalorder %s642_s21, 2  ;;  %s431_s8 = sand.u32 1, %s630_s18  }
 0x157   : > { %s432_s9 = scalar_lea.sflag [#allocation3], %s431_s8 }
 0x158   : > { %p536_p7 = pnand %p539_p4, %p718_p6 }
 0x15a   : > { %p537_p8 = pneg %p536_p7 }
 0x15c   : > { %625 = dma.done.wait (%p537_p8), %s432_s9, 256  }
 0x15d   : > { %627 = vsyncadd (%p537_p8), %s432_s9, 4294967040  ;;  %p15_p9 = scmp.ge.s32.totalorder %s701_s24, 4   ;;  %s801_s18 = smov %s634_s19 }
 0x15e   : > { %s802_s19 = smov %s638_s20  ;;  %s803_s20 = smov %s712_s27 }
 0x15f   : > { %s804_s21 = smov %s701_s24  ;;  %17 = sbr.rel (!%p15_p9) target bundleno = 3 (0x3), region = 81 }
 0x164   :  { %438 = vsyncpa [#allocation3], 1 }
 0x165   :  { %440 = vsyncpa [#allocation3 + $0x1], 1 }

</bundles_post_ra>
